<compile_context>
chip_gen: v7x
topology: tpu7x:2x2x1
jax: 0.10.0
libtpu: 0.0.40
codegen_flags: <defaults>
</compile_context>

<pallas_src>
import jax
import jax.numpy as jnp
from jax.experimental import pallas as pl
from jax.experimental.pallas import tpu as pltpu


ATOM_CLASSES = 16   # nn.Embedding(atom_classes=16, ...)
ATOM_HIDDEN = 33    # nn.Embedding(..., atom_hidden=33)
_OTH_LO, _OTH_HI = 44, 75          # molecule_atoms[i][:, 44:75]
_OTH_W = _OTH_HI - _OTH_LO         # 31


def _round_up(x, m):
    return (x + m - 1) // m * m


def _atom_rep_kernel(n_ref, atom_ref, oth_ref, emb_ref, o_ref):
    # n_ref:    SMEM (1,) int32 -- number of valid rows (= N * atoms_per_molecule)
    # atom_ref: VMEM (tm, 16)   -- molecule_atoms[..., 0:16]   (row block)
    # oth_ref:  VMEM (tm, 31)   -- molecule_atoms[..., 44:75]  (row block)
    # emb_ref:  VMEM (16, 33)   -- embed_comg weight table
    # o_ref:    VMEM (tm, C)    -- output row block (C >= 64)
    tm = atom_ref.shape[0]

    atom = atom_ref[...].astype(jnp.float32)                       # (tm, 16)

    # first-occurrence argmax over the 16 class columns (all-int32 tie-break)
    col = jax.lax.broadcasted_iota(jnp.int32, atom.shape, 1)
    row_max = jnp.max(atom, axis=1, keepdims=True)
    picked = jnp.min(
        jnp.where(atom >= row_max, col, jnp.int32(ATOM_CLASSES)),
        axis=1, keepdims=True)                                     # (tm, 1) int32

    # embedding lookup as 16 VPU select-accumulates against the table rows
    # (skips the mostly-padding MXU matmul and its result-FIFO latency)
    emb = emb_ref[...].astype(jnp.float32)                         # (16, 33)
    com = jnp.zeros((tm, ATOM_HIDDEN), jnp.float32)
    for k in range(ATOM_CLASSES):
        com = com + jnp.where(picked == jnp.int32(k),
                              emb[k:k + 1, :], jnp.float32(0.0))   # (tm, 33)

    # tf = F.normalize(oth1, dim=1), eps = 1e-12 (exact division: keeps
    # bit-level agreement with the reference)
    oth = oth_ref[...].astype(jnp.float32)                         # (tm, 31)
    nrm = jnp.sqrt(jnp.sum(oth * oth, axis=1, keepdims=True))
    tf = oth / jnp.maximum(nrm, jnp.float32(1e-12))

    # zero out rows belonging to molecules i >= N (and any pad rows)
    row0 = pl.program_id(0) * tm
    ridx = row0 + jax.lax.broadcasted_iota(jnp.int32, (tm, 1), 0)
    valid = ridx < n_ref[0]
    com = jnp.where(valid, com, jnp.float32(0.0))
    tf = jnp.where(valid, tf, jnp.float32(0.0))

    # explicit zero-fill (Pallas output blocks are NOT zero-initialized), then
    # two lane-slice stores; no (tm, C) concatenate temporary.
    o_ref[...] = jnp.zeros(o_ref.shape, o_ref.dtype)
    o_ref[:, 0:ATOM_HIDDEN] = com.astype(o_ref.dtype)
    o_ref[:, ATOM_HIDDEN:ATOM_HIDDEN + _OTH_W] = tf.astype(o_ref.dtype)


def atom_rep_forward(molecule_atoms, embed_table, N, channels, *, block_rows=1024):
    """Atom_rep.forward(molecule_atoms, N) -> (M, A, channels) float32."""
    M, A, F = molecule_atoms.shape
    assert F >= _OTH_HI, "forward reads feature columns 44:75"
    assert channels >= ATOM_HIDDEN + _OTH_W, "forward writes output columns 0:64"

    rows = M * A
    x = molecule_atoms.reshape(rows, F)            # wrapper-side metadata reshape
    atom_fea = x[:, 0:ATOM_CLASSES]                # only hand the kernel the
    oth1 = x[:, _OTH_LO:_OTH_HI]                   # 16 + 31 columns it reads
    # TODO(synk): if the upstream producer can emit these two slices directly,
    #             even the wrapper-side column-slice copies disappear.

    tm = min(int(block_rows), _round_up(rows, 8))  # sublane-aligned row block
    rows_pad = _round_up(rows, tm)
    if rows_pad != rows:
        pad = rows_pad - rows
        atom_fea = jnp.pad(atom_fea, ((0, pad), (0, 0)))
        oth1 = jnp.pad(oth1, ((0, pad), (0, 0)))

    # number of valid rows, as a scalar-prefetch SMEM arg (no recompile per N)
    n_rows_valid = jnp.asarray(N, jnp.int32).reshape((1,)) * jnp.int32(A)

    out2d = pl.pallas_call(
        _atom_rep_kernel,
        out_shape=jax.ShapeDtypeStruct((rows_pad, channels), jnp.float32),
        grid_spec=pltpu.PrefetchScalarGridSpec(
            num_scalar_prefetch=1,
            grid=(rows_pad // tm,),
            in_specs=[
                pl.BlockSpec((tm, ATOM_CLASSES), lambda i, n: (i, 0)),
                pl.BlockSpec((tm, _OTH_W), lambda i, n: (i, 0)),
                pl.BlockSpec((ATOM_CLASSES, ATOM_HIDDEN), lambda i, n: (0, 0)),
            ],
            out_specs=pl.BlockSpec((tm, channels), lambda i, n: (i, 0)),
        ),
        compiler_params=pltpu.CompilerParams(
            # row blocks are independent -> shard across both v7x TensorCores
            dimension_semantics=("parallel",),
        ),
    )(n_rows_valid, atom_fea, oth1, embed_table)

    return out2d[:rows].reshape(M, A, channels)


def _reference_atom_rep(molecule_atoms, embed_table, N, channels):
    # Pure-JAX transcription of the PyTorch loop, for the correctness check.
    M, A, _ = molecule_atoms.shape
    out = jnp.zeros((M, A, channels), jnp.float32)
    for i in range(int(N)):
        atom_fea = molecule_atoms[i, :, 0:ATOM_CLASSES]
        p = jnp.argmax(atom_fea, axis=1)
        com = embed_table[p]
        oth1 = molecule_atoms[i, :, _OTH_LO:_OTH_HI]
        nrm = jnp.sqrt(jnp.sum(oth1 * oth1, axis=1, keepdims=True))
        tf = oth1 / jnp.maximum(nrm, 1e-12)
        out = out.at[i, :, 0:ATOM_HIDDEN].set(com)
        out = out.at[i, :, ATOM_HIDDEN:ATOM_HIDDEN + _OTH_W].set(tf)
    return out


if __name__ == "__main__":
    # Small shapes implied by the module: 2 molecules, 8 atoms each,
    # 80 raw features (>= 75), channels = 64 (forward fills columns 0:64).
    M, A, F = 2, 8, 80
    CHANNELS = 64

    key = jax.random.PRNGKey(0)
    k_atoms, k_emb = jax.random.split(key)
    molecule_atoms = jax.random.normal(k_atoms, (M, A, F), jnp.float32)
    embed_table = jax.random.normal(k_emb, (ATOM_CLASSES, ATOM_HIDDEN), jnp.float32)

    ok = True
    for n in (M, 1):   # full batch, and a partially-valid batch (masking path)
        out = jax.block_until_ready(
            atom_rep_forward(molecule_atoms, embed_table, n, CHANNELS))
        ref = _reference_atom_rep(molecule_atoms, embed_table, n, CHANNELS)
        ok = ok and (out.shape == (M, A, CHANNELS))
        ok = ok and bool(jnp.allclose(out, ref, atol=1e-5, rtol=1e-5))
    assert ok, "mismatch vs pure-JAX reference"

    print("KERNEL_OK")
</pallas_src>

<mosaic_0001>
module attributes {stable_mosaic.version = 11 : i64} {
  func.func @_atom_rep_kernel(%arg0: i32, %arg1: memref<1xi32, #tpu.memory_space<smem>>, %arg2: memref<16x16xf32, #tpu.memory_space<vmem>>, %arg3: memref<16x31xf32, #tpu.memory_space<vmem>>, %arg4: memref<16x33xf32, #tpu.memory_space<vmem>>, %arg5: memref<16x64xf32, #tpu.memory_space<vmem>>) attributes {dimension_semantics = [#tpu.dimension_semantics<parallel>], iteration_bounds = array<i64: 1>, scalar_prefetch = 1 : i64, scratch_operands = 0 : i64, tpu.core_type = #tpu.core_type<tc>, window_params = [{transform_indices = @transform_0, window_bounds = array<i64: 16, 16>}, {transform_indices = @transform_1, window_bounds = array<i64: 16, 31>}, {pipeline_mode = #tpu.pipeline_mode<synchronous>, transform_indices = @transform_2, window_bounds = array<i64: 16, 33>}, {transform_indices = @transform_3, window_bounds = array<i64: 16, 64>}]} {
    %c0 = arith.constant 0 : index
    %c0_0 = arith.constant 0 : index
    %0 = vector.load %arg2[%c0, %c0_0] : memref<16x16xf32, #tpu.memory_space<vmem>>, vector<16x16xf32>
    %1 = tpu.iota {dimensions = array<i32: 1>} : vector<16x16xi32>
    %cst = arith.constant dense<0xFF800000> : vector<16xf32>
    %2 = vector.multi_reduction <maximumf>, %0, %cst [1] : vector<16x16xf32> to vector<16xf32>
    %3 = vector.shape_cast %2 : vector<16xf32> to vector<16x1xf32>
    %4 = vector.broadcast %3 : vector<16x1xf32> to vector<16x16xf32>
    %5 = arith.cmpf oge, %0, %4 : vector<16x16xf32>
    %c16_i32 = arith.constant 16 : i32
    %6 = vector.broadcast %c16_i32 : i32 to vector<16x16xi32>
    %7 = arith.select %5, %1, %6 : vector<16x16xi1>, vector<16x16xi32>
    %cst_1 = arith.constant dense<2147483647> : vector<16xi32>
    %8 = vector.multi_reduction <minsi>, %7, %cst_1 [1] : vector<16x16xi32> to vector<16xi32>
    %9 = vector.shape_cast %8 : vector<16xi32> to vector<16x1xi32>
    %c0_2 = arith.constant 0 : index
    %c0_3 = arith.constant 0 : index
    %10 = vector.load %arg4[%c0_2, %c0_3] : memref<16x33xf32, #tpu.memory_space<vmem>>, vector<16x33xf32>
    %cst_4 = arith.constant 0.000000e+00 : f32
    %11 = vector.broadcast %cst_4 : f32 to vector<16x33xf32>
    %c0_i32 = arith.constant 0 : i32
    %12 = vector.broadcast %c0_i32 : i32 to vector<16x1xi32>
    %13 = arith.cmpi eq, %9, %12 : vector<16x1xi32>
    %14 = vector.extract_strided_slice %10 {offsets = [0, 0], sizes = [1, 33], strides = [1, 1]} : vector<16x33xf32> to vector<1x33xf32>
    %cst_5 = arith.constant 0.000000e+00 : f32
    %15 = vector.shape_cast %13 : vector<16x1xi1> to vector<16x1xi1>
    %16 = vector.broadcast %15 : vector<16x1xi1> to vector<16x33xi1>
    %17 = vector.shape_cast %14 : vector<1x33xf32> to vector<1x33xf32>
    %18 = vector.broadcast %17 : vector<1x33xf32> to vector<16x33xf32>
    %19 = vector.broadcast %cst_5 : f32 to vector<16x33xf32>
    %20 = arith.select %16, %18, %19 : vector<16x33xi1>, vector<16x33xf32>
    %21 = arith.addf %11, %20 : vector<16x33xf32>
    %c1_i32 = arith.constant 1 : i32
    %22 = vector.broadcast %c1_i32 : i32 to vector<16x1xi32>
    %23 = arith.cmpi eq, %9, %22 : vector<16x1xi32>
    %24 = vector.extract_strided_slice %10 {offsets = [1, 0], sizes = [1, 33], strides = [1, 1]} : vector<16x33xf32> to vector<1x33xf32>
    %cst_6 = arith.constant 0.000000e+00 : f32
    %25 = vector.shape_cast %23 : vector<16x1xi1> to vector<16x1xi1>
    %26 = vector.broadcast %25 : vector<16x1xi1> to vector<16x33xi1>
    %27 = vector.shape_cast %24 : vector<1x33xf32> to vector<1x33xf32>
    %28 = vector.broadcast %27 : vector<1x33xf32> to vector<16x33xf32>
    %29 = vector.broadcast %cst_6 : f32 to vector<16x33xf32>
    %30 = arith.select %26, %28, %29 : vector<16x33xi1>, vector<16x33xf32>
    %31 = arith.addf %21, %30 : vector<16x33xf32>
    %c2_i32 = arith.constant 2 : i32
    %32 = vector.broadcast %c2_i32 : i32 to vector<16x1xi32>
    %33 = arith.cmpi eq, %9, %32 : vector<16x1xi32>
    %34 = vector.extract_strided_slice %10 {offsets = [2, 0], sizes = [1, 33], strides = [1, 1]} : vector<16x33xf32> to vector<1x33xf32>
    %cst_7 = arith.constant 0.000000e+00 : f32
    %35 = vector.shape_cast %33 : vector<16x1xi1> to vector<16x1xi1>
    %36 = vector.broadcast %35 : vector<16x1xi1> to vector<16x33xi1>
    %37 = vector.shape_cast %34 : vector<1x33xf32> to vector<1x33xf32>
    %38 = vector.broadcast %37 : vector<1x33xf32> to vector<16x33xf32>
    %39 = vector.broadcast %cst_7 : f32 to vector<16x33xf32>
    %40 = arith.select %36, %38, %39 : vector<16x33xi1>, vector<16x33xf32>
    %41 = arith.addf %31, %40 : vector<16x33xf32>
    %c3_i32 = arith.constant 3 : i32
    %42 = vector.broadcast %c3_i32 : i32 to vector<16x1xi32>
    %43 = arith.cmpi eq, %9, %42 : vector<16x1xi32>
    %44 = vector.extract_strided_slice %10 {offsets = [3, 0], sizes = [1, 33], strides = [1, 1]} : vector<16x33xf32> to vector<1x33xf32>
    %cst_8 = arith.constant 0.000000e+00 : f32
    %45 = vector.shape_cast %43 : vector<16x1xi1> to vector<16x1xi1>
    %46 = vector.broadcast %45 : vector<16x1xi1> to vector<16x33xi1>
    %47 = vector.shape_cast %44 : vector<1x33xf32> to vector<1x33xf32>
    %48 = vector.broadcast %47 : vector<1x33xf32> to vector<16x33xf32>
    %49 = vector.broadcast %cst_8 : f32 to vector<16x33xf32>
    %50 = arith.select %46, %48, %49 : vector<16x33xi1>, vector<16x33xf32>
    %51 = arith.addf %41, %50 : vector<16x33xf32>
    %c4_i32 = arith.constant 4 : i32
    %52 = vector.broadcast %c4_i32 : i32 to vector<16x1xi32>
    %53 = arith.cmpi eq, %9, %52 : vector<16x1xi32>
    %54 = vector.extract_strided_slice %10 {offsets = [4, 0], sizes = [1, 33], strides = [1, 1]} : vector<16x33xf32> to vector<1x33xf32>
    %cst_9 = arith.constant 0.000000e+00 : f32
    %55 = vector.shape_cast %53 : vector<16x1xi1> to vector<16x1xi1>
    %56 = vector.broadcast %55 : vector<16x1xi1> to vector<16x33xi1>
    %57 = vector.shape_cast %54 : vector<1x33xf32> to vector<1x33xf32>
    %58 = vector.broadcast %57 : vector<1x33xf32> to vector<16x33xf32>
    %59 = vector.broadcast %cst_9 : f32 to vector<16x33xf32>
    %60 = arith.select %56, %58, %59 : vector<16x33xi1>, vector<16x33xf32>
    %61 = arith.addf %51, %60 : vector<16x33xf32>
    %c5_i32 = arith.constant 5 : i32
    %62 = vector.broadcast %c5_i32 : i32 to vector<16x1xi32>
    %63 = arith.cmpi eq, %9, %62 : vector<16x1xi32>
    %64 = vector.extract_strided_slice %10 {offsets = [5, 0], sizes = [1, 33], strides = [1, 1]} : vector<16x33xf32> to vector<1x33xf32>
    %cst_10 = arith.constant 0.000000e+00 : f32
    %65 = vector.shape_cast %63 : vector<16x1xi1> to vector<16x1xi1>
    %66 = vector.broadcast %65 : vector<16x1xi1> to vector<16x33xi1>
    %67 = vector.shape_cast %64 : vector<1x33xf32> to vector<1x33xf32>
    %68 = vector.broadcast %67 : vector<1x33xf32> to vector<16x33xf32>
    %69 = vector.broadcast %cst_10 : f32 to vector<16x33xf32>
    %70 = arith.select %66, %68, %69 : vector<16x33xi1>, vector<16x33xf32>
    %71 = arith.addf %61, %70 : vector<16x33xf32>
    %c6_i32 = arith.constant 6 : i32
    %72 = vector.broadcast %c6_i32 : i32 to vector<16x1xi32>
    %73 = arith.cmpi eq, %9, %72 : vector<16x1xi32>
    %74 = vector.extract_strided_slice %10 {offsets = [6, 0], sizes = [1, 33], strides = [1, 1]} : vector<16x33xf32> to vector<1x33xf32>
    %cst_11 = arith.constant 0.000000e+00 : f32
    %75 = vector.shape_cast %73 : vector<16x1xi1> to vector<16x1xi1>
    %76 = vector.broadcast %75 : vector<16x1xi1> to vector<16x33xi1>
    %77 = vector.shape_cast %74 : vector<1x33xf32> to vector<1x33xf32>
    %78 = vector.broadcast %77 : vector<1x33xf32> to vector<16x33xf32>
    %79 = vector.broadcast %cst_11 : f32 to vector<16x33xf32>
    %80 = arith.select %76, %78, %79 : vector<16x33xi1>, vector<16x33xf32>
    %81 = arith.addf %71, %80 : vector<16x33xf32>
    %c7_i32 = arith.constant 7 : i32
    %82 = vector.broadcast %c7_i32 : i32 to vector<16x1xi32>
    %83 = arith.cmpi eq, %9, %82 : vector<16x1xi32>
    %84 = vector.extract_strided_slice %10 {offsets = [7, 0], sizes = [1, 33], strides = [1, 1]} : vector<16x33xf32> to vector<1x33xf32>
    %cst_12 = arith.constant 0.000000e+00 : f32
    %85 = vector.shape_cast %83 : vector<16x1xi1> to vector<16x1xi1>
    %86 = vector.broadcast %85 : vector<16x1xi1> to vector<16x33xi1>
    %87 = vector.shape_cast %84 : vector<1x33xf32> to vector<1x33xf32>
    %88 = vector.broadcast %87 : vector<1x33xf32> to vector<16x33xf32>
    %89 = vector.broadcast %cst_12 : f32 to vector<16x33xf32>
    %90 = arith.select %86, %88, %89 : vector<16x33xi1>, vector<16x33xf32>
    %91 = arith.addf %81, %90 : vector<16x33xf32>
    %c8_i32 = arith.constant 8 : i32
    %92 = vector.broadcast %c8_i32 : i32 to vector<16x1xi32>
    %93 = arith.cmpi eq, %9, %92 : vector<16x1xi32>
    %94 = vector.extract_strided_slice %10 {offsets = [8, 0], sizes = [1, 33], strides = [1, 1]} : vector<16x33xf32> to vector<1x33xf32>
    %cst_13 = arith.constant 0.000000e+00 : f32
    %95 = vector.shape_cast %93 : vector<16x1xi1> to vector<16x1xi1>
    %96 = vector.broadcast %95 : vector<16x1xi1> to vector<16x33xi1>
    %97 = vector.shape_cast %94 : vector<1x33xf32> to vector<1x33xf32>
    %98 = vector.broadcast %97 : vector<1x33xf32> to vector<16x33xf32>
    %99 = vector.broadcast %cst_13 : f32 to vector<16x33xf32>
    %100 = arith.select %96, %98, %99 : vector<16x33xi1>, vector<16x33xf32>
    %101 = arith.addf %91, %100 : vector<16x33xf32>
    %c9_i32 = arith.constant 9 : i32
    %102 = vector.broadcast %c9_i32 : i32 to vector<16x1xi32>
    %103 = arith.cmpi eq, %9, %102 : vector<16x1xi32>
    %104 = vector.extract_strided_slice %10 {offsets = [9, 0], sizes = [1, 33], strides = [1, 1]} : vector<16x33xf32> to vector<1x33xf32>
    %cst_14 = arith.constant 0.000000e+00 : f32
    %105 = vector.shape_cast %103 : vector<16x1xi1> to vector<16x1xi1>
    %106 = vector.broadcast %105 : vector<16x1xi1> to vector<16x33xi1>
    %107 = vector.shape_cast %104 : vector<1x33xf32> to vector<1x33xf32>
    %108 = vector.broadcast %107 : vector<1x33xf32> to vector<16x33xf32>
    %109 = vector.broadcast %cst_14 : f32 to vector<16x33xf32>
    %110 = arith.select %106, %108, %109 : vector<16x33xi1>, vector<16x33xf32>
    %111 = arith.addf %101, %110 : vector<16x33xf32>
    %c10_i32 = arith.constant 10 : i32
    %112 = vector.broadcast %c10_i32 : i32 to vector<16x1xi32>
    %113 = arith.cmpi eq, %9, %112 : vector<16x1xi32>
    %114 = vector.extract_strided_slice %10 {offsets = [10, 0], sizes = [1, 33], strides = [1, 1]} : vector<16x33xf32> to vector<1x33xf32>
    %cst_15 = arith.constant 0.000000e+00 : f32
    %115 = vector.shape_cast %113 : vector<16x1xi1> to vector<16x1xi1>
    %116 = vector.broadcast %115 : vector<16x1xi1> to vector<16x33xi1>
    %117 = vector.shape_cast %114 : vector<1x33xf32> to vector<1x33xf32>
    %118 = vector.broadcast %117 : vector<1x33xf32> to vector<16x33xf32>
    %119 = vector.broadcast %cst_15 : f32 to vector<16x33xf32>
    %120 = arith.select %116, %118, %119 : vector<16x33xi1>, vector<16x33xf32>
    %121 = arith.addf %111, %120 : vector<16x33xf32>
    %c11_i32 = arith.constant 11 : i32
    %122 = vector.broadcast %c11_i32 : i32 to vector<16x1xi32>
    %123 = arith.cmpi eq, %9, %122 : vector<16x1xi32>
    %124 = vector.extract_strided_slice %10 {offsets = [11, 0], sizes = [1, 33], strides = [1, 1]} : vector<16x33xf32> to vector<1x33xf32>
    %cst_16 = arith.constant 0.000000e+00 : f32
    %125 = vector.shape_cast %123 : vector<16x1xi1> to vector<16x1xi1>
    %126 = vector.broadcast %125 : vector<16x1xi1> to vector<16x33xi1>
    %127 = vector.shape_cast %124 : vector<1x33xf32> to vector<1x33xf32>
    %128 = vector.broadcast %127 : vector<1x33xf32> to vector<16x33xf32>
    %129 = vector.broadcast %cst_16 : f32 to vector<16x33xf32>
    %130 = arith.select %126, %128, %129 : vector<16x33xi1>, vector<16x33xf32>
    %131 = arith.addf %121, %130 : vector<16x33xf32>
    %c12_i32 = arith.constant 12 : i32
    %132 = vector.broadcast %c12_i32 : i32 to vector<16x1xi32>
    %133 = arith.cmpi eq, %9, %132 : vector<16x1xi32>
    %134 = vector.extract_strided_slice %10 {offsets = [12, 0], sizes = [1, 33], strides = [1, 1]} : vector<16x33xf32> to vector<1x33xf32>
    %cst_17 = arith.constant 0.000000e+00 : f32
    %135 = vector.shape_cast %133 : vector<16x1xi1> to vector<16x1xi1>
    %136 = vector.broadcast %135 : vector<16x1xi1> to vector<16x33xi1>
    %137 = vector.shape_cast %134 : vector<1x33xf32> to vector<1x33xf32>
    %138 = vector.broadcast %137 : vector<1x33xf32> to vector<16x33xf32>
    %139 = vector.broadcast %cst_17 : f32 to vector<16x33xf32>
    %140 = arith.select %136, %138, %139 : vector<16x33xi1>, vector<16x33xf32>
    %141 = arith.addf %131, %140 : vector<16x33xf32>
    %c13_i32 = arith.constant 13 : i32
    %142 = vector.broadcast %c13_i32 : i32 to vector<16x1xi32>
    %143 = arith.cmpi eq, %9, %142 : vector<16x1xi32>
    %144 = vector.extract_strided_slice %10 {offsets = [13, 0], sizes = [1, 33], strides = [1, 1]} : vector<16x33xf32> to vector<1x33xf32>
    %cst_18 = arith.constant 0.000000e+00 : f32
    %145 = vector.shape_cast %143 : vector<16x1xi1> to vector<16x1xi1>
    %146 = vector.broadcast %145 : vector<16x1xi1> to vector<16x33xi1>
    %147 = vector.shape_cast %144 : vector<1x33xf32> to vector<1x33xf32>
    %148 = vector.broadcast %147 : vector<1x33xf32> to vector<16x33xf32>
    %149 = vector.broadcast %cst_18 : f32 to vector<16x33xf32>
    %150 = arith.select %146, %148, %149 : vector<16x33xi1>, vector<16x33xf32>
    %151 = arith.addf %141, %150 : vector<16x33xf32>
    %c14_i32 = arith.constant 14 : i32
    %152 = vector.broadcast %c14_i32 : i32 to vector<16x1xi32>
    %153 = arith.cmpi eq, %9, %152 : vector<16x1xi32>
    %154 = vector.extract_strided_slice %10 {offsets = [14, 0], sizes = [1, 33], strides = [1, 1]} : vector<16x33xf32> to vector<1x33xf32>
    %cst_19 = arith.constant 0.000000e+00 : f32
    %155 = vector.shape_cast %153 : vector<16x1xi1> to vector<16x1xi1>
    %156 = vector.broadcast %155 : vector<16x1xi1> to vector<16x33xi1>
    %157 = vector.shape_cast %154 : vector<1x33xf32> to vector<1x33xf32>
    %158 = vector.broadcast %157 : vector<1x33xf32> to vector<16x33xf32>
    %159 = vector.broadcast %cst_19 : f32 to vector<16x33xf32>
    %160 = arith.select %156, %158, %159 : vector<16x33xi1>, vector<16x33xf32>
    %161 = arith.addf %151, %160 : vector<16x33xf32>
    %c15_i32 = arith.constant 15 : i32
    %162 = vector.broadcast %c15_i32 : i32 to vector<16x1xi32>
    %163 = arith.cmpi eq, %9, %162 : vector<16x1xi32>
    %164 = vector.extract_strided_slice %10 {offsets = [15, 0], sizes = [1, 33], strides = [1, 1]} : vector<16x33xf32> to vector<1x33xf32>
    %cst_20 = arith.constant 0.000000e+00 : f32
    %165 = vector.shape_cast %163 : vector<16x1xi1> to vector<16x1xi1>
    %166 = vector.broadcast %165 : vector<16x1xi1> to vector<16x33xi1>
    %167 = vector.shape_cast %164 : vector<1x33xf32> to vector<1x33xf32>
    %168 = vector.broadcast %167 : vector<1x33xf32> to vector<16x33xf32>
    %169 = vector.broadcast %cst_20 : f32 to vector<16x33xf32>
    %170 = arith.select %166, %168, %169 : vector<16x33xi1>, vector<16x33xf32>
    %171 = arith.addf %161, %170 : vector<16x33xf32>
    %c0_21 = arith.constant 0 : index
    %c0_22 = arith.constant 0 : index
    %172 = vector.load %arg3[%c0_21, %c0_22] : memref<16x31xf32, #tpu.memory_space<vmem>>, vector<16x31xf32>
    %173 = arith.mulf %172, %172 : vector<16x31xf32>
    %cst_23 = arith.constant dense<0.000000e+00> : vector<16xf32>
    %174 = vector.multi_reduction <add>, %173, %cst_23 [1] : vector<16x31xf32> to vector<16xf32>
    %175 = vector.shape_cast %174 : vector<16xf32> to vector<16x1xf32>
    %176 = math.sqrt %175 : vector<16x1xf32>
    %cst_24 = arith.constant 9.99999996E-13 : f32
    %177 = vector.broadcast %cst_24 : f32 to vector<16x1xf32>
    %178 = arith.maximumf %176, %177 : vector<16x1xf32>
    %179 = vector.broadcast %178 : vector<16x1xf32> to vector<16x31xf32>
    %180 = arith.divf %172, %179 : vector<16x31xf32>
    %c16_i32_25 = arith.constant 16 : i32
    %181 = arith.muli %arg0, %c16_i32_25 : i32
    %182 = tpu.iota {dimensions = array<i32: 0>} : vector<16x1xi32>
    %183 = vector.broadcast %181 : i32 to vector<16x1xi32>
    %184 = arith.addi %183, %182 : vector<16x1xi32>
    %c0_26 = arith.constant 0 : index
    %185 = memref.load %arg1[%c0_26] : memref<1xi32, #tpu.memory_space<smem>>
    %186 = vector.broadcast %185 : i32 to vector<16x1xi32>
    %187 = arith.cmpi slt, %184, %186 : vector<16x1xi32>
    %cst_27 = arith.constant 0.000000e+00 : f32
    %188 = vector.shape_cast %187 : vector<16x1xi1> to vector<16x1xi1>
    %189 = vector.broadcast %188 : vector<16x1xi1> to vector<16x33xi1>
    %190 = vector.broadcast %cst_27 : f32 to vector<16x33xf32>
    %191 = arith.select %189, %171, %190 : vector<16x33xi1>, vector<16x33xf32>
    %cst_28 = arith.constant 0.000000e+00 : f32
    %192 = vector.shape_cast %187 : vector<16x1xi1> to vector<16x1xi1>
    %193 = vector.broadcast %192 : vector<16x1xi1> to vector<16x31xi1>
    %194 = vector.broadcast %cst_28 : f32 to vector<16x31xf32>
    %195 = arith.select %193, %180, %194 : vector<16x31xi1>, vector<16x31xf32>
    %cst_29 = arith.constant 0.000000e+00 : f32
    %196 = vector.broadcast %cst_29 : f32 to vector<16x64xf32>
    %c0_30 = arith.constant 0 : index
    %c0_31 = arith.constant 0 : index
    %197 = vector.load %arg5[%c0_30, %c0_31] : memref<16x64xf32, #tpu.memory_space<vmem>>, vector<16x64xf32>
    tpu.vector_store %arg5[%c0_30, %c0_31], %196 {strides = array<i32>} : memref<16x64xf32, #tpu.memory_space<vmem>>, vector<16x64xf32>,
    %c0_32 = arith.constant 0 : index
    %c0_33 = arith.constant 0 : index
    %198 = vector.load %arg5[%c0_32, %c0_33] : memref<16x64xf32, #tpu.memory_space<vmem>>, vector<16x33xf32>
    tpu.vector_store %arg5[%c0_32, %c0_33], %191 {strides = array<i32>} : memref<16x64xf32, #tpu.memory_space<vmem>>, vector<16x33xf32>,
    %c0_34 = arith.constant 0 : index
    %c33 = arith.constant 33 : index
    %199 = vector.load %arg5[%c0_34, %c33] : memref<16x64xf32, #tpu.memory_space<vmem>>, vector<16x31xf32>
    tpu.vector_store %arg5[%c0_34, %c33], %195 {strides = array<i32>} : memref<16x64xf32, #tpu.memory_space<vmem>>, vector<16x31xf32>,
    return
  }
  func.func @transform_0(%arg0: i32, %arg1: memref<1xi32, #tpu.memory_space<smem>>) -> (i32, i32) {
    %c0_i32 = arith.constant 0 : i32
    %c0_i32_0 = arith.constant 0 : i32
    return %arg0, %c0_i32 : i32, i32
  }
  func.func @transform_1(%arg0: i32, %arg1: memref<1xi32, #tpu.memory_space<smem>>) -> (i32, i32) {
    %c0_i32 = arith.constant 0 : i32
    %c0_i32_0 = arith.constant 0 : i32
    return %arg0, %c0_i32 : i32, i32
  }
  func.func @transform_2(%arg0: i32, %arg1: memref<1xi32, #tpu.memory_space<smem>>) -> (i32, i32) {
    %c0_i32 = arith.constant 0 : i32
    %c0_i32_0 = arith.constant 0 : i32
    %c0_i32_1 = arith.constant 0 : i32
    return %c0_i32, %c0_i32_0 : i32, i32
  }
  func.func @transform_3(%arg0: i32, %arg1: memref<1xi32, #tpu.memory_space<smem>>) -> (i32, i32) {
    %c0_i32 = arith.constant 0 : i32
    %c0_i32_0 = arith.constant 0 : i32
    return %arg0, %c0_i32 : i32, i32
  }
}

</mosaic_0001>

<bundles_post_ra>
// kernel: tpu_custom_call.1
= control target key start
LH: loop header
LB: loop body
LE: loop exit
PB: predicated region body
PF: predicated region fallthrough
CT: control target
= control target key end

     0   :  { %10 = vsyncpa [#allocation5], 0  ;;  %s737_s0 = inlined_call_operand.<no memory space> [shape: s32[1], index: 0, kind: input, shape index: {}]   ;;  %s738_s1 = inlined_call_operand.hbm [shape: f32[16,16], index: 1, kind: input, shape index: {}]   ;;  %s739_s2 = inlined_call_operand.hbm [shape: f32[16,31], index: 2, kind: input, shape index: {}]   ;;  %s740_s3 = inlined_call_operand.hbm [shape: f32[16,33], index: 3, kind: input, shape index: {}]   ;;  %s741_s4 = inlined_call_operand.hbm [shape: f32[16,64], index: 4, kind: output, shape index: {}]  }
   0x1   :  { %11 = vsyncpa [#allocation8], 0 }
   0x2   :  { %12 = vsyncpa [#allocation6], 0  ;;  %s524_s15 = smov [#allocation7]   ;;  %s525_s17 = smov [#allocation4]  }
   0x3   :  { %s30_s16 = sshll.u32 %s524_s15, 4  ;;  %s18_s18 = sshll.u32 %s525_s17, 4  ;;  %s31_s16 = int_to_ptr.vmem [resolvable:$true] %s30_s16  ;;  %s557_s18 = int_to_ptr.vmem [resolvable:$true] %s18_s18 }
   0x4   :  { %s430_s21 = scalar_lea.hbm %s739_s2, 256 }
   0x5   :  { %p431_p0 = scmp.ne.s32.totalorder %s739_s2, %s430_s21  ;;  %p434_p1 = scmp.lt.u32.totalorder %s430_s21, %s739_s2 }
   0x7   :  { %p436_p2 = pnand %p434_p1, %p431_p0 }
   0x9   :  { %439 = shalt.err (!%p436_p2)
}
   0xa   :  { %s440_s26 = scalar_lea.vmem %s31_s16, 256  ;;  %p445_p4 = scmp.lt.s32.totalorder %s31_s16, %s31_s16 }
   0xb   :  { %p441_p3 = scmp.ne.s32.totalorder %s31_s16, %s440_s26  ;;  %p446_p5 = scmp.lt.s32.totalorder %s440_s26, %s440_s26 }
   0xd   :  { %p447_p6 = por %p446_p5, %p445_p4 }
   0xf   :  { %p448_p7 = pnand %p447_p6, %p441_p3 }
  0x11   :  { %451 = shalt.err (!%p448_p7)
}
  0x12   :  { %s526_s27 = smov 128   ;;  %s527_s28 = smov 8  }
  0x13   :  { %36 = dma.hbm_to_vmem [thread:$0]  %s739_s2, 256, %s31_s16, [#allocation8], %s526_s27, %s526_s27, %s527_s28  }
  0x14   :  { %s452_s7 = scalar_lea.hbm %s738_s1, 256 }
  0x15   :  { %p453_p8 = scmp.ne.s32.totalorder %s738_s1, %s452_s7  ;;  %p456_p9 = scmp.lt.u32.totalorder %s452_s7, %s738_s1 }
  0x17   :  { %p458_p10 = pnand %p456_p9, %p453_p8 }
  0x19   :  { %461 = shalt.err (!%p458_p10)
}
  0x1a   :  { %s462_s12 = scalar_lea.vmem %s557_s18, 256  ;;  %p467_p12 = scmp.lt.s32.totalorder %s557_s18, %s557_s18 }
  0x1b   :  { %p463_p11 = scmp.ne.s32.totalorder %s557_s18, %s462_s12  ;;  %p468_p13 = scmp.lt.s32.totalorder %s462_s12, %s462_s12 }
  0x1d   :  { %p469_p0 = por %p468_p13, %p467_p12 }
  0x1f   :  { %p470_p1 = pnand %p469_p0, %p463_p11 }
  0x21   :  { %473 = shalt.err (!%p470_p1)
}
  0x22   :  { %24 = dma.hbm_to_vmem [thread:$0]  %s738_s1, 256, %s557_s18, [#allocation5], %s526_s27, %s526_s27, %s527_s28  }
  0x23   :  { %s528_s14 = smov [#allocation9]   ;;  %s474_s19 = scalar_lea.hbm %s740_s3, 256 }
  0x24   :  { %s42_s15 = sshll.u32 %s528_s14, 4  ;;  %p475_p2 = scmp.ne.s32.totalorder %s740_s3, %s474_s19  ;;  %s43_s15 = int_to_ptr.vmem [resolvable:$true] %s42_s15 }
  0x25   :  { %p478_p3 = scmp.lt.u32.totalorder %s474_s19, %s740_s3 }
  0x27   :  { %p480_p4 = pnand %p478_p3, %p475_p2 }
  0x29   :  { %483 = shalt.err (!%p480_p4)
}
  0x2a   :  { %s484_s24 = scalar_lea.vmem %s43_s15, 256  ;;  %p489_p6 = scmp.lt.s32.totalorder %s43_s15, %s43_s15 }
  0x2b   :  { %p485_p5 = scmp.ne.s32.totalorder %s43_s15, %s484_s24  ;;  %p490_p7 = scmp.lt.s32.totalorder %s484_s24, %s484_s24 }
  0x2d   :  { %p491_p8 = por %p490_p7, %p489_p6 }
  0x2f   :  { %p492_p9 = pnand %p491_p8, %p485_p5 }
  0x31   :  { %495 = shalt.err (!%p492_p9)
}
  0x32   :  { %48 = dma.hbm_to_vmem [thread:$0]  %s740_s3, 256, %s43_s15, [#allocation8], %s526_s27, %s526_s27, %s527_s28  }
  0x33   :  { %518 = dma.done.wait [#allocation5], 256  }
  0x34   :  { %519 = vsyncadd [#allocation5], 4294967040 }
  0x35   :  { %520 = dma.done.wait [#allocation8], 512  }
  0x36   :  { %521 = vsyncadd [#allocation8], 4294966784  ;;  %vm62_vm0 = vcmask 130048   ;;  %v58_v0 = vld [vmem:[#allocation4] sm:$0xff]  ;;  %v59_v1 = vld [vmem:[#allocation4 + $0x8] sm:$0xff]  ;;  %vm333_vm1 = vcmask 252928   ;;  %v60_v7 = vlaneseq  ;;  %v368_v39 = vstv %s737_s0 }
  0x37   :  { %v63_v2 = vsel %vm62_vm0, %v58_v0, -inf  ;;  %v66_v3 = vsel %vm62_vm0, %v59_v1, -inf  ;;  %v329_v4 = vld [vmem:[#allocation7] sm:$0xff]  ;;  %v330_v16 = vld [vmem:[#allocation7 + $0x8] sm:$0xff]  ;;  %s529_s0 = smov 33   ;;  %vm379_vm12 = vcmask 523264  }
  0x38   :  { %64 = vmax.xlane.f32.xlu0 %v63_v2  ;;  %v331_v5 = vmul.f32 %v329_v4, %v329_v4  ;;  %v61_v8 = vand.u32 127, %v60_v7  ;;  %v332_v19 = vmul.f32 %v330_v16, %v330_v16  ;;  %v618_v40 = vshrl.u32 %v60_v7, 7  ;;  %v103_v59 = vld [vmem:[#allocation9] sm:$0xff]  ;;  %s531_s26 = smov [#allocation10]  }
  0x39   :  { %v530_v55 = vmov 0.0   ;;  %s401_s29 = sshll.u32 %s531_s26, 4  ;;  %s402_s29 = int_to_ptr.vmem [resolvable:$true] %s401_s29 }
  0x3a   :  { %v334_v6 = vsel %vm333_vm1, %v331_v5, 0.0  ;;  %v337_v21 = vsel %vm333_vm1, %v332_v19, 0.0  ;;  %vm621_vm9 = vcmp.lt.s32.totalorder %v618_v40, %v368_v39  ;;  %v363_v50 = vadd.s32 8, %v618_v40  ;;  %380 = vst.msk [vmem:[#allocation10] sm:$0xff] %vm379_vm12, %v530_v55  ;;  %381 = vst.msk [vmem:[#allocation10 + $0x8] sm:$0xff] %vm379_vm12, %v530_v55  ;;  %s496_s30 = scalar_lea.vmem %s402_s29, 256  ;;  %p501_p11 = scmp.lt.s32.totalorder %s402_s29, %s402_s29 }
  0x3b   :  { %v113_v57 = vsub.s32 0, %v618_v40  ;;  %v127_v58 = vsub.s32 1, %v618_v40  ;;  %v141_v62 = vsub.s32 2, %v618_v40  ;;  %v169_v5 = vsub.s32 4, %v618_v40  ;;  %p497_p10 = scmp.ne.s32.totalorder %s402_s29, %s496_s30  ;;  %p502_p12 = scmp.lt.s32.totalorder %s496_s30, %s496_s30 }
  0x3c   :  { %67 = vmax.xlane.f32.xlu0 %v66_v3  ;;  %vm628_vm11 = vcmp.lt.s32.totalorder %v363_v50, %v368_v39  ;;  %v155_v3 = vsub.s32 3, %v618_v40  ;;  %v197_v19 = vsub.s32 6, %v618_v40 }
  0x3d   :  { %v128_v2 = vrot.slane %v103_v59, %v127_v58  ;;  %p503_p13 = por %p502_p12, %p501_p11 }
  0x3f   :  { %p504_p0 = pnand %p503_p13, %p497_p10 }
  0x40   :  { %335 = vadd.xlane.f32.xlu0 %v334_v6 }
  0xc5   :  { %v65_v9 = vpop.xlane.xlu0 %64 }
  0xc6   :  { %vm69_vm2 = vcmp.ge.f32.partialorder %v58_v0, %v65_v9  ;;  %v183_v9 = vsub.s32 5, %v618_v40 }
  0xc7   :  { %v71_v10 = vsel %vm69_vm2, %v61_v8, 16 }
  0xc8   :  { %v73_v11 = vsel %vm62_vm0, %v71_v10, 2147483647 }
  0xc9   :  { %v68_v12 = vpop.xlane.xlu0 %67  ;;  %v75_v13 = vshra.s32 %v73_v11, 16  ;;  %v74_v27 = vand.u32 65535, %v73_v11 }
  0xca   :  { %vm70_vm3 = vcmp.ge.f32.partialorder %v59_v1, %v68_v12  ;;  %v114_v1 = vrot.slane %v103_v59, %v113_v57 }
  0xcb   :  { %v72_v14 = vsel %vm70_vm3, %v61_v8, 16  ;;  %v77_v15 = vcvt.s32.f32 %v75_v13  ;;  %v76_v30 = vcvt.s32.f32 %v74_v27  ;;  %v142_v8 = vrot.slane %v103_v59, %v141_v62 }
  0xcc   :  { %v88_v17 = vsel %vm62_vm0, %v72_v14, 2147483647  ;;  %v156_v13 = vrot.slane %v103_v59, %v155_v3 }
  0xcd   :  { %78 = vmin.xlane.f32.xlu1 %v77_v15  ;;  %v90_v18 = vshra.s32 %v88_v17, 16  ;;  %v336_v22 = vpop.xlane.xlu0 %335  ;;  %v89_v31 = vand.u32 65535, %v88_v17 }
  0xce   :  { %422 = vrsqrt.f32 %v336_v22  ;;  %vm342_vm4 = vcmp.eq.f32.partialorder %v336_v22, inf  ;;  %v345_v25 = vand.u32 2147483648, %v336_v22  ;;  %vm344_vm5 = vcmp.eq.f32.partialorder %v336_v22, 0.0 }
  0xcf   :  { %v92_v20 = vcvt.s32.f32 %v90_v18  ;;  %v91_v35 = vcvt.s32.f32 %v89_v31  ;;  %v184_v18 = vrot.slane %v103_v59, %v183_v9 }
  0xd1   :  { %93 = vmin.xlane.f32.xlu1 %v92_v20 }
  0xd5   :  { %338 = vadd.xlane.f32.xlu1 %v337_v21 }
  0xd8   :  { %v423_v23 = vpop.eup %422 }
  0xd9   :  { %v341_v24 = vmul.f32 %v423_v23, %v336_v22 }
  0xdb   :  { %v343_v26 = vsel %vm342_vm4, %v336_v22, %v341_v24  ;;  %v211_v24 = vsub.s32 7, %v618_v40 }
  0xdc   :  { %v346_v28 = vsel %vm344_vm5, %v345_v25, %v343_v26 }
  0xdd   :  { %v354_v32 = vmax.f32 %v346_v28, 1e-12 }
  0xdf   :  { %424 = vrcp.f32 %v354_v32 }
  0xe9   :  { %v425_v38 = vpop.eup %424 }
  0xea   :  { %v357_v41 = vmul.f32 %v425_v38, %v329_v4 }
  0xec   :  { %v377_v47 = vsel %vm621_vm9, %v357_v41, 0.0 }
 0x15a   :  { %v79_v29 = vpop.xlane.xlu1 %78 }
 0x15b   :  { %vm80_vm6 = vcmp.eq.f32.partialorder %v77_v15, %v79_v29  ;;  %v85_v56 = vcvt.f32.s32 %v79_v29  ;;  %v198_v29 = vrot.slane %v103_v59, %v197_v19 }
 0x15c   :  { %v81_v33 = vsel %vm80_vm6, %v76_v30, inf  ;;  %v670_v30 = vld [vmem:[#allocation9 + $0x8] sm:$0xff] }
 0x15d   :  { %82 = vmin.xlane.f32.xlu0 %v81_v33  ;;  %v86_v63 = vshll.u32 %v85_v56, 16  ;;  %v226_v41 = vrot.slane %v670_v30, %v113_v57 }
 0x15e   :  { %v94_v34 = vpop.xlane.xlu1 %93 }
 0x15f   :  { %vm95_vm7 = vcmp.eq.f32.partialorder %v92_v20, %v94_v34  ;;  %v100_v60 = vcvt.f32.s32 %v94_v34 }
 0x160   :  { %v96_v36 = vsel %vm95_vm7, %v91_v35, inf  ;;  %v212_v35 = vrot.slane %v103_v59, %v211_v24 }
 0x161   :  { %97 = vmin.xlane.f32.xlu1 %v96_v36  ;;  %v101_v6 = vshll.u32 %v100_v60, 16 }
 0x162   :  { %v339_v37 = vpop.xlane.xlu1 %338 }
 0x163   :  { %426 = vrsqrt.f32 %v339_v37  ;;  %vm349_vm8 = vcmp.eq.f32.partialorder %v339_v37, inf  ;;  %v352_v43 = vand.u32 2147483648, %v339_v37  ;;  %vm351_vm10 = vcmp.eq.f32.partialorder %v339_v37, 0.0 }
 0x16d   :  { %v427_v42 = vpop.eup %426 }
 0x16e   :  { %v348_v45 = vmul.f32 %v427_v42, %v339_v37 }
 0x170   :  { %v350_v46 = vsel %vm349_vm8, %v339_v37, %v348_v45 }
 0x171   :  { %v353_v48 = vsel %vm351_vm10, %v352_v43, %v350_v46 }
 0x172   :  { %v355_v49 = vmax.f32 %v353_v48, 1e-12 }
 0x173   :  { %387 = vrot.lane.b32.xlu0 %v377_v47, %s529_s0  ;;  %v240_v47 = vrot.slane %v670_v30, %v127_v58  ;;  %v268_v58 = vrot.slane %v670_v30, %v155_v3 }
 0x174   :  { %428 = vrcp.f32 %v355_v49 }
 0x17e   :  { %v429_v51 = vpop.eup %428 }
 0x17f   :  { %v359_v53 = vmul.f32 %v429_v51, %v330_v16  ;;  %v170_v16 = vrot.slane %v103_v59, %v169_v5 }
 0x181   :  { %v378_v54 = vsel %vm628_vm11, %v359_v53, 0.0  ;;  %v254_v53 = vrot.slane %v670_v30, %v141_v62 }
 0x182   :  { %389 = vrot.lane.b32.xlu1 %v378_v54, %s529_s0 }
 0x1ea   :  { %v83_v61 = vpop.xlane.xlu0 %82 }
 0x1eb   :  { %v84_v0 = vcvt.f32.s32 %v83_v61 }
 0x1ed   :  { %v640_v4 = vadd.s32 %v86_v63, %v84_v0  ;;  %v282_v63 = vrot.slane %v670_v30, %v169_v5 }
 0x1ee   :  { %v98_v7 = vpop.xlane.xlu1 %97 }
 0x1ef   :  { %v99_v10 = vcvt.f32.s32 %v98_v7  ;;  %vm105_vm13 = vcmp.eq.s32.totalorder %v640_v4, 0  ;;  %vm119_vm14 = vcmp.eq.s32.totalorder %v640_v4, 1  ;;  %vm133_vm15 = vcmp.eq.s32.totalorder %v640_v4, 2 }
 0x1f0   :  { %v115_v11 = vsel %vm105_vm13, %v114_v1, 0.0  ;;  %v129_v12 = vsel %vm119_vm14, %v128_v2, 0.0  ;;  %vm147_vm0 = vcmp.eq.s32.totalorder %v640_v4, 3  ;;  %v143_v17 = vsel %vm133_vm15, %v142_v8, 0.0 }
 0x1f1   :  { %v651_v14 = vadd.s32 %v101_v6, %v99_v10  ;;  %v131_v15 = vadd.f32 %v129_v12, %v115_v11  ;;  %vm161_vm1 = vcmp.eq.s32.totalorder %v640_v4, 4  ;;  %v157_v23 = vsel %vm147_vm0, %v156_v13, 0.0 }
 0x1f2   :  { %vm175_vm6 = vcmp.eq.s32.totalorder %v640_v4, 5  ;;  %v171_v28 = vsel %vm161_vm1, %v170_v16, 0.0  ;;  %vm189_vm8 = vcmp.eq.s32.totalorder %v640_v4, 6  ;;  %vm203_vm12 = vcmp.eq.s32.totalorder %v640_v4, 7 }
 0x1f3   :  { %vm106_vm2 = vcmp.eq.s32.totalorder %v651_v14, 0  ;;  %vm120_vm3 = vcmp.eq.s32.totalorder %v651_v14, 1  ;;  %vm134_vm4 = vcmp.eq.s32.totalorder %v651_v14, 2  ;;  %v145_v20 = vadd.f32 %v143_v17, %v131_v15 }
 0x1f4   :  { %v116_v21 = vsel %vm106_vm2, %v114_v1, 0.0  ;;  %v130_v22 = vsel %vm120_vm3, %v128_v2, 0.0  ;;  %vm148_vm5 = vcmp.eq.s32.totalorder %v651_v14, 3  ;;  %v144_v27 = vsel %vm134_vm4, %v142_v8, 0.0 }
 0x1f5   :  { %v132_v25 = vadd.f32 %v130_v22, %v116_v21  ;;  %v159_v26 = vadd.f32 %v157_v23, %v145_v20  ;;  %vm162_vm7 = vcmp.eq.s32.totalorder %v651_v14, 4  ;;  %v158_v33 = vsel %vm148_vm5, %v156_v13, 0.0 }
 0x1f6   :  { %v185_v34 = vsel %vm175_vm6, %v184_v18, 0.0  ;;  %vm176_vm10 = vcmp.eq.s32.totalorder %v651_v14, 5  ;;  %v172_v38 = vsel %vm162_vm7, %v170_v16, 0.0  ;;  %v199_v39 = vsel %vm189_vm8, %v198_v29, 0.0 }
 0x1f7   :  { %v146_v31 = vadd.f32 %v144_v27, %v132_v25  ;;  %v173_v32 = vadd.f32 %v171_v28, %v159_v26  ;;  %vm190_vm13 = vcmp.eq.s32.totalorder %v651_v14, 6  ;;  %vm217_vm14 = vcmp.eq.s32.totalorder %v640_v4, 8 }
 0x1f8   :  { %v186_v45 = vsel %vm176_vm10, %v184_v18, 0.0  ;;  %v213_v46 = vsel %vm203_vm12, %v212_v35, 0.0  ;;  %vm204_vm15 = vcmp.eq.s32.totalorder %v651_v14, 7  ;;  %vm231_vm0 = vcmp.eq.s32.totalorder %v640_v4, 9 }
 0x1f9   :  { %v160_v36 = vadd.f32 %v158_v33, %v146_v31  ;;  %v187_v37 = vadd.f32 %v185_v34, %v173_v32  ;;  %v200_v50 = vsel %vm190_vm13, %v198_v29, 0.0  ;;  %v227_v51 = vsel %vm217_vm14, %v226_v41, 0.0 }
 0x1fa   :  { %vm218_vm1 = vcmp.eq.s32.totalorder %v651_v14, 8  ;;  %vm245_vm2 = vcmp.eq.s32.totalorder %v640_v4, 10  ;;  %v214_v56 = vsel %vm204_vm15, %v212_v35, 0.0  ;;  %v241_v57 = vsel %vm231_vm0, %v240_v47, 0.0 }
 0x1fb   :  { %v174_v42 = vadd.f32 %v172_v38, %v160_v36  ;;  %v201_v43 = vadd.f32 %v199_v39, %v187_v37  ;;  %vm232_vm3 = vcmp.eq.s32.totalorder %v651_v14, 9  ;;  %vm259_vm4 = vcmp.eq.s32.totalorder %v640_v4, 11 }
 0x1fc   :  { %v228_v61 = vsel %vm218_vm1, %v226_v41, 0.0  ;;  %v255_v62 = vsel %vm245_vm2, %v254_v53, 0.0  ;;  %vm246_vm5 = vcmp.eq.s32.totalorder %v651_v14, 10  ;;  %vm273_vm6 = vcmp.eq.s32.totalorder %v640_v4, 12 }
 0x1fd   :  { %v188_v48 = vadd.f32 %v186_v45, %v174_v42  ;;  %v215_v49 = vadd.f32 %v213_v46, %v201_v43  ;;  %v242_v2 = vsel %vm232_vm3, %v240_v47, 0.0  ;;  %v269_v3 = vsel %vm259_vm4, %v268_v58, 0.0 }
 0x1fe   :  { %v296_v6 = vrot.slane %v670_v30, %v183_v9  ;;  %vm260_vm7 = vcmp.eq.s32.totalorder %v651_v14, 11  ;;  %vm287_vm8 = vcmp.eq.s32.totalorder %v640_v4, 13  ;;  %v256_v10 = vsel %vm246_vm5, %v254_v53, 0.0 }
 0x1ff   :  { %v202_v54 = vadd.f32 %v200_v50, %v188_v48  ;;  %v229_v55 = vadd.f32 %v227_v51, %v215_v49  ;;  %v283_v5 = vsel %vm273_vm6, %v282_v63, 0.0  ;;  %v310_v11 = vrot.slane %v670_v30, %v197_v19 }
 0x200   :  { %vm274_vm10 = vcmp.eq.s32.totalorder %v651_v14, 12  ;;  %vm301_vm12 = vcmp.eq.s32.totalorder %v640_v4, 14  ;;  %v270_v15 = vsel %vm260_vm7, %v268_v58, 0.0  ;;  %v297_v9 = vsel %vm287_vm8, %v296_v6, 0.0 }
 0x201   :  { %v216_v59 = vadd.f32 %v214_v56, %v202_v54  ;;  %v243_v60 = vadd.f32 %v241_v57, %v229_v55  ;;  %v324_v16 = vrot.slane %v670_v30, %v211_v24  ;;  %vm288_vm13 = vcmp.eq.s32.totalorder %v651_v14, 13 }
 0x202   :  { %vm315_vm14 = vcmp.eq.s32.totalorder %v640_v4, 15  ;;  %v284_v20 = vsel %vm274_vm10, %v282_v63, 0.0  ;;  %v311_v19 = vsel %vm301_vm12, %v310_v11, 0.0  ;;  %vm302_vm15 = vcmp.eq.s32.totalorder %v651_v14, 14  ;;  %v388_v4 = vpop.permute.xlu0 %387 }
 0x203   :  { %v230_v0 = vadd.f32 %v228_v61, %v216_v59  ;;  %v257_v1 = vadd.f32 %v255_v62, %v243_v60  ;;  %v298_v23 = vsel %vm288_vm13, %v296_v6, 0.0  ;;  %v325_v25 = vsel %vm315_vm14, %v324_v16, 0.0 }
 0x204   :  { %vm316_vm0 = vcmp.eq.s32.totalorder %v651_v14, 15  ;;  %vm382_vm1 = vcmask 269312   ;;  %v312_v24 = vsel %vm302_vm15, %v310_v11, 0.0  ;;  %vm393_vm2 = vcmask 523528   ;;  %v390_v14 = vpop.permute.xlu1 %389 }
 0x205   :  { %v244_v7 = vadd.f32 %v242_v2, %v230_v0  ;;  %v271_v8 = vadd.f32 %v269_v3, %v257_v1  ;;  %v326_v29 = vsel %vm316_vm0, %v324_v16, 0.0 }
 0x207   :  { %v258_v12 = vadd.f32 %v256_v10, %v244_v7  ;;  %v285_v13 = vadd.f32 %v283_v5, %v271_v8 }
 0x209   :  { %v272_v17 = vadd.f32 %v270_v15, %v258_v12  ;;  %v299_v18 = vadd.f32 %v297_v9, %v285_v13 }
 0x20b   :  { %v286_v21 = vadd.f32 %v284_v20, %v272_v17  ;;  %v313_v22 = vadd.f32 %v311_v19, %v299_v18 }
 0x20d   :  { %v300_v26 = vadd.f32 %v298_v23, %v286_v21  ;;  %v327_v40 = vadd.f32 %v325_v25, %v313_v22 }
 0x20f   :  { %v314_v27 = vadd.f32 %v312_v24, %v300_v26  ;;  %v375_v28 = vsel %vm621_vm9, %v327_v40, 0.0 }
 0x210   :  { %383 = vst.msk [vmem:[#allocation10] sm:$0xff] %vm382_vm1, %v375_v28 }
 0x211   :  { %v328_v30 = vadd.f32 %v326_v29, %v314_v27  ;;  %394 = vst.msk [vmem:[#allocation10] sm:$0xff] %vm393_vm2, %v388_v4 }
 0x213   :  { %v376_v31 = vsel %vm628_vm11, %v328_v30, 0.0 }
 0x214   :  { %384 = vst.msk [vmem:[#allocation10 + $0x8] sm:$0xff] %vm382_vm1, %v376_v31 }
 0x215   :  { %395 = vst.msk [vmem:[#allocation10 + $0x8] sm:$0xff] %vm393_vm2, %v390_v14 }
 0x216   :  { %507 = shalt.err (!%p504_p0)
}
 0x217   :  { %s508_s7 = scalar_lea.hbm %s741_s4, 256 }
 0x218   :  { %p509_p1 = scmp.ne.s32.totalorder %s741_s4, %s508_s7  ;;  %p512_p2 = scmp.lt.u32.totalorder %s508_s7, %s741_s4 }
 0x21a   :  { %p514_p3 = pnand %p512_p2, %p509_p1 }
 0x21c   :  { %517 = shalt.err (!%p514_p3)
}
 0x21d   :  { %407 = dma.vmem_to_hbm [thread:$0]  %s402_s29, 256, %s741_s4, [#allocation6], %s526_s27, %s526_s27, %s527_s28  }
 0x21e   :  { %522 = dma.done.wait [#allocation6], 256  }
 0x21f   :  { %523 = vsyncadd [#allocation6], 4294967040 }
 0x220   :  { %411 = vsyncpa [#allocation5], 1 }
 0x221   :  { %412 = vsyncpa [#allocation8], 1 }
 0x222   :  { %413 = vsyncpa [#allocation6], 1 }

</bundles_post_ra>
